<compile_context>
chip_gen: v6e
topology: v6e:2x2x1
jax: 0.10.0
libtpu: 0.0.40
codegen_flags: <defaults>
</compile_context>

<pallas_src>
import functools

import jax
import jax.numpy as jnp
from jax.experimental import pallas as pl
from jax.experimental.pallas import tpu as pltpu

_LANE = 128
_SUBLANE = 8
_TARGET_TILE_BYTES = 4 * 1024 * 1024      # per x / out tile (4 buffers ~16 MiB)
_VMEM_LIMIT_BYTES = 32 * 1024 * 1024      # safe on v5e / v6e / v7x
_MAX_TILE_TOTAL_BYTES = 24 * 1024 * 1024  # feasibility bound for ragged-F path


def _round_up(n, m):
    return ((n + m - 1) // m) * m


def _rowdy_kernel(x_ref, p_ref, o_ref, *, compute_dtype):
    """One (bm, bf) elementwise tile.

    p_ref is a (6, bf) parameter slab with rows [w, b, v, c, alpha, beta];
    static slices of a VMEM ref are free and broadcast over the bm rows.
    """
    x = x_ref[...].astype(compute_dtype)      # (bm, bf)
    w = p_ref[0:1, :]                         # (1, bf)
    b = p_ref[1:2, :]
    v = p_ref[2:3, :]
    c = p_ref[3:4, :]
    alpha = p_ref[4:5, :]
    beta = p_ref[5:6, :]
    out = jnp.tanh(x) + alpha * jnp.cos(w * x + b) + beta * jnp.sin(v * x + c)
    o_ref[...] = out.astype(o_ref.dtype)


def _feature_tile(f_lane, max_tile):
    """Largest multiple of 128 that divides f_lane and is <= max_tile."""
    if f_lane <= max_tile:
        return f_lane
    best = _LANE
    t = _LANE
    while t <= max_tile:
        if f_lane % t == 0:
            best = t
        t += _LANE
    return best


def rowdy_forward(x, w, b, v, c, alpha, beta, *,
                  block_feats=512, compute_dtype=None):
    """x: (..., F); params: (F,). Returns x.shape array in x.dtype.

    compute_dtype: jnp.bfloat16 is a reasonable choice on v6e/v7x (bf16
    EUP/VPU); keep the default (x.dtype) on v5e.
    """
    orig_dtype = x.dtype
    orig_shape = x.shape
    F = orig_shape[-1]

    if compute_dtype is None:
        compute_dtype = orig_dtype
    compute_dtype = jnp.dtype(compute_dtype)
    itemsize = max(jnp.dtype(orig_dtype).itemsize, compute_dtype.itemsize)

    # Elementwise with broadcast on the last axis -> flatten leading dims.
    x2 = x.reshape(-1, F)
    B = x2.shape[0]

    # One packed (6, F) parameter slab: a single BlockSpec / DMA / VMEM tile.
    params = jnp.stack([w, b, v, c, alpha, beta], axis=0).astype(compute_dtype)

    # ---- Lane-dense layout for the feature (last) axis. ---------------------
    pack = 1
    if F % _LANE == 0:
        F_lane, rows = F, B
        p2 = params
    elif _LANE % F == 0:
        # Fold `pack` consecutive batch rows into one lane-dense 128-wide row
        # (free bitcast reshape when B % pack == 0, tiny pad otherwise).
        pack = _LANE // F
        F_lane = _LANE
        rows = -(-B // pack)
        if rows * pack != B:
            x2 = jnp.pad(x2, ((0, rows * pack - B), (0, 0)))
        x2 = x2.reshape(rows, F_lane)
        p2 = jnp.tile(params, (1, pack))                     # (6, 128)
    elif 4 * _SUBLANE * F * itemsize <= _MAX_TILE_TOTAL_BYTES:
        # Ragged feature axis: keep un-padded; masked lane stores in-kernel
        # are cheaper than extra pad/unpad HBM passes for a mem-bound op.
        F_lane, rows = F, B
        p2 = params
    else:
        # Huge ragged feature axis: pad to a lane multiple so it can be tiled.
        F_lane = _round_up(F, _LANE)
        rows = B
        x2 = jnp.pad(x2, ((0, 0), (0, F_lane - F)))
        p2 = jnp.pad(params, ((0, 0), (0, F_lane - F)))

    # ---- Tile sizes (byte-target driven, VMEM-budget safe). -----------------
    if F_lane % _LANE == 0:
        bf = _feature_tile(F_lane, block_feats)
    else:
        bf = F_lane                              # full (ragged) feature block
    bm = _TARGET_TILE_BYTES // (bf * itemsize)
    bm = max(_SUBLANE, (bm // _SUBLANE) * _SUBLANE)
    bm = min(bm, _round_up(rows, _SUBLANE))

    grid = (pl.cdiv(rows, bm), pl.cdiv(F_lane, bf))

    kernel = functools.partial(_rowdy_kernel, compute_dtype=compute_dtype)
    out = pl.pallas_call(
        kernel,
        out_shape=jax.ShapeDtypeStruct((rows, F_lane), orig_dtype),
        grid_spec=pl.GridSpec(
            grid=grid,
            in_specs=[
                pl.BlockSpec((bm, bf), lambda i, j: (i, j)),   # x tile
                pl.BlockSpec((6, bf), lambda i, j: (0, j)),    # param slab
            ],
            out_specs=pl.BlockSpec((bm, bf), lambda i, j: (i, j)),
        ),
        compiler_params=pltpu.CompilerParams(
            dimension_semantics=("parallel", "parallel"),
            vmem_limit_bytes=_VMEM_LIMIT_BYTES,
        ),
    )(x2, p2)

    # ---- Undo the wrapper-side layout plumbing. ------------------------------
    if pack > 1:
        out = out.reshape(rows * pack, F)[:B]
    elif F_lane != F:
        out = out[:, :F]
    return out.reshape(orig_shape)


def rowdy_reference(x, w, b, v, c, alpha, beta):
    phi1 = jnp.tanh(x)
    phi2 = alpha * jnp.cos(w * x + b)
    phi3 = beta * jnp.sin(v * x + c)
    return phi1 + phi2 + phi3


if __name__ == "__main__":
    key = jax.random.PRNGKey(0)
    k_x, k_w, k_b, k_v, k_c = jax.random.split(key, 5)

    B, F = 8, 32  # small shapes: batch of 8 samples, 32 features
    x = jax.random.normal(k_x, (B, F), dtype=jnp.float32)

    # Deterministic "randn"-style parameter init (matches nn.Parameter shapes).
    w = jax.random.normal(k_w, (F,), dtype=jnp.float32)
    b = jax.random.normal(k_b, (F,), dtype=jnp.float32)
    v = jax.random.normal(k_v, (F,), dtype=jnp.float32)
    c = jax.random.normal(k_c, (F,), dtype=jnp.float32)
    alpha = jnp.ones((F,), dtype=jnp.float32) * 0.1
    beta = jnp.ones((F,), dtype=jnp.float32) * 0.1

    out = rowdy_forward(x, w, b, v, c, alpha, beta)
    out = jax.block_until_ready(out)

    ref = rowdy_reference(x, w, b, v, c, alpha, beta)
    assert out.shape == (B, F) and out.dtype == jnp.float32
    assert jnp.allclose(out, ref, atol=1e-5, rtol=1e-5)

    print("KERNEL_OK")
</pallas_src>

<mosaic_0001>
module attributes {stable_mosaic.version = 11 : i64} {
  func.func @_rowdy_kernel(%arg0: i32, %arg1: i32, %arg2: memref<8x128xf32, #tpu.memory_space<vmem>>, %arg3: memref<6x128xf32, #tpu.memory_space<vmem>>, %arg4: memref<8x128xf32, #tpu.memory_space<vmem>>) attributes {dimension_semantics = [#tpu.dimension_semantics<parallel>, #tpu.dimension_semantics<parallel>], iteration_bounds = array<i64: 1, 1>, scalar_prefetch = 0 : i64, scratch_operands = 0 : i64, tpu.core_type = #tpu.core_type<tc>, window_params = [{transform_indices = @transform_0, window_bounds = array<i64: 8, 128>}, {transform_indices = @transform_1, window_bounds = array<i64: 6, 128>}, {transform_indices = @transform_2, window_bounds = array<i64: 8, 128>}]} {
    %c0 = arith.constant 0 : index
    %c0_0 = arith.constant 0 : index
    %0 = vector.load %arg2[%c0, %c0_0] : memref<8x128xf32, #tpu.memory_space<vmem>>, vector<8x128xf32>
    %c0_1 = arith.constant 0 : index
    %c0_2 = arith.constant 0 : index
    %1 = vector.load %arg3[%c0_1, %c0_2] : memref<6x128xf32, #tpu.memory_space<vmem>>, vector<1x128xf32>
    %c1 = arith.constant 1 : index
    %c0_3 = arith.constant 0 : index
    %2 = vector.load %arg3[%c1, %c0_3] : memref<6x128xf32, #tpu.memory_space<vmem>>, vector<1x128xf32>
    %c2 = arith.constant 2 : index
    %c0_4 = arith.constant 0 : index
    %3 = vector.load %arg3[%c2, %c0_4] : memref<6x128xf32, #tpu.memory_space<vmem>>, vector<1x128xf32>
    %c3 = arith.constant 3 : index
    %c0_5 = arith.constant 0 : index
    %4 = vector.load %arg3[%c3, %c0_5] : memref<6x128xf32, #tpu.memory_space<vmem>>, vector<1x128xf32>
    %c4 = arith.constant 4 : index
    %c0_6 = arith.constant 0 : index
    %5 = vector.load %arg3[%c4, %c0_6] : memref<6x128xf32, #tpu.memory_space<vmem>>, vector<1x128xf32>
    %c5 = arith.constant 5 : index
    %c0_7 = arith.constant 0 : index
    %6 = vector.load %arg3[%c5, %c0_7] : memref<6x128xf32, #tpu.memory_space<vmem>>, vector<1x128xf32>
    %7 = math.tanh %0 : vector<8x128xf32>
    %8 = vector.broadcast %1 : vector<1x128xf32> to vector<8x128xf32>
    %9 = arith.mulf %8, %0 : vector<8x128xf32>
    %10 = vector.broadcast %2 : vector<1x128xf32> to vector<8x128xf32>
    %11 = arith.addf %9, %10 : vector<8x128xf32>
    %12 = math.cos %11 : vector<8x128xf32>
    %13 = vector.broadcast %5 : vector<1x128xf32> to vector<8x128xf32>
    %14 = arith.mulf %13, %12 : vector<8x128xf32>
    %15 = arith.addf %7, %14 : vector<8x128xf32>
    %16 = vector.broadcast %3 : vector<1x128xf32> to vector<8x128xf32>
    %17 = arith.mulf %16, %0 : vector<8x128xf32>
    %18 = vector.broadcast %4 : vector<1x128xf32> to vector<8x128xf32>
    %19 = arith.addf %17, %18 : vector<8x128xf32>
    %20 = math.sin %19 : vector<8x128xf32>
    %21 = vector.broadcast %6 : vector<1x128xf32> to vector<8x128xf32>
    %22 = arith.mulf %21, %20 : vector<8x128xf32>
    %23 = arith.addf %15, %22 : vector<8x128xf32>
    %c0_8 = arith.constant 0 : index
    %c0_9 = arith.constant 0 : index
    %24 = vector.load %arg4[%c0_8, %c0_9] : memref<8x128xf32, #tpu.memory_space<vmem>>, vector<8x128xf32>
    tpu.vector_store %arg4[%c0_8, %c0_9], %23 {strides = array<i32>} : memref<8x128xf32, #tpu.memory_space<vmem>>, vector<8x128xf32>,
    return
  }
  func.func @transform_0(%arg0: i32, %arg1: i32) -> (i32, i32) {
    %c0_i32 = arith.constant 0 : i32
    return %arg0, %arg1 : i32, i32
  }
  func.func @transform_1(%arg0: i32, %arg1: i32) -> (i32, i32) {
    %c0_i32 = arith.constant 0 : i32
    %c0_i32_0 = arith.constant 0 : i32
    return %c0_i32, %arg1 : i32, i32
  }
  func.func @transform_2(%arg0: i32, %arg1: i32) -> (i32, i32) {
    %c0_i32 = arith.constant 0 : i32
    return %arg0, %arg1 : i32, i32
  }
}

</mosaic_0001>

<bundles_post_ra>
// kernel: tpu_custom_call.1
= control target key start
LH: loop header
LB: loop body
LE: loop exit
PB: predicated region body
PF: predicated region fallthrough
CT: control target
= control target key end

     0   :  { %7 = vsyncpa [#allocation3], 0  ;;  %s545_s0 = inlined_call_operand.hbm [shape: f32[2,128], index: 0, kind: input, shape index: {}]   ;;  %s546_s1 = inlined_call_operand.hbm [shape: f32[6,128], index: 1, kind: input, shape index: {}]   ;;  %s547_s2 = inlined_call_operand.hbm [shape: f32[2,128], index: 2, kind: output, shape index: {}]  }
   0x1   :  { %8 = vsyncpa [#allocation6], 0 }
   0x2   :  { %9 = vsyncpa [#allocation4], 0 }
   0x3   :  { %14 = vsyncadd [#allocation3], 96  ;;  %s413_s9 = smov [#allocation2]  }
   0x4   :  { %s15_s10 = sshll.u32 %s413_s9, 4  ;;  %s16_s10 = int_to_ptr.vmem [resolvable:$true] %s15_s10 }
   0x5   :  { %s355_s11 = scalar_lea.vmem %s16_s10, 32  ;;  %s359_s12 = scalar_lea.vmem %s16_s10, 128 }
   0x6   :  { %p356_p0 = scmp.ne.s32.totalorder %s16_s10, %s355_s11  ;;  %p360_p1 = scmp.lt.s32.totalorder %s16_s10, %s16_s10 }
   0x7   :  { %p361_p2 = scmp.lt.s32.totalorder %s359_s12, %s355_s11 }
   0x9   :  { %p362_p3 = por %p361_p2, %p360_p1 }
   0xb   :  { %p363_p4 = pnand %p362_p3, %p356_p0 }
   0xd   :  { %366 = shalt.err (!%p363_p4)
}
   0xe   :  { %s414_s13 = smov 32   ;;  %s415_s14 = smov 2  }
   0xf   :  { %21 = dma.hbm_to_vmem [thread:$0]  %s545_s0, 32, %s16_s10, [#allocation3], %s414_s13, %s414_s13, %s415_s14  }
  0x10   :  { %s416_s17 = smov [#allocation5]  }
  0x11   :  { %s28_s18 = sshll.u32 %s416_s17, 4  ;;  %s29_s18 = int_to_ptr.vmem [resolvable:$true] %s28_s18 }
  0x12   :  { %s375_s19 = scalar_lea.vmem %s29_s18, 128  ;;  %p380_p6 = scmp.lt.s32.totalorder %s29_s18, %s29_s18 }
  0x13   :  { %p376_p5 = scmp.ne.s32.totalorder %s29_s18, %s375_s19  ;;  %p381_p7 = scmp.lt.s32.totalorder %s375_s19, %s375_s19 }
  0x15   :  { %p382_p8 = por %p381_p7, %p380_p6 }
  0x17   :  { %p383_p9 = pnand %p382_p8, %p376_p5 }
  0x19   :  { %386 = shalt.err (!%p383_p9)
}
  0x1a   :  { %31 = dma.hbm_to_vmem [thread:$0]  %s546_s1, 128, %s29_s18, [#allocation6]  }
  0x1b   :  { %407 = dma.done.wait [#allocation3], 128  }
  0x1c   :  { %408 = vsyncadd [#allocation3], 4294967168 }
  0x1d   :  { %409 = dma.done.wait [#allocation6], 128  }
  0x1e   :  { %410 = vsyncadd [#allocation6], 4294967168  ;;  %v448_v0 = vld [vmem:[#allocation2] sm:$0xff]  ;;  %v304_v1 = vld [vmem:[#allocation5] ss:$0 sm:$0xff] }
  0x1f   :  { %v305_v2 = vld [vmem:[#allocation5 + $0x1] ss:$0 sm:$0xff]  ;;  %v311_v3 = vld [vmem:[#allocation5 + $0x2] ss:$0 sm:$0xff]  ;;  %v312_v4 = vld [vmem:[#allocation5 + $0x3] ss:$0 sm:$0xff]  ;;  %v50_v5 = vmul.f32 %v304_v1, %v448_v0 }
  0x20   :  { %v169_v6 = vmul.f32 %v311_v3, %v448_v0  ;;  %v417_v31 = vmov 683565275   ;;  %v418_v33 = vmov 2475754826   ;;  %v419_v35 = vmov 2131351028  }
  0x21   :  { %v452_v7 = vadd.f32 %v305_v2, %v50_v5  ;;  %v420_v37 = vmov 2102212464   ;;  %v421_v39 = vmov 920167782   ;;  %v422_v47 = vmov 1326507024  }
  0x22   :  { %v454_v8 = vadd.f32 %v312_v4, %v169_v6 }
  0x23   :  { %v56_v9 = vand.u32 2147483647, %v452_v7  ;;  %v59_v10 = vand.u32 2139095040, %v452_v7  ;;  %vm58_vm14 = vcmp.lt.s32.totalorder %v452_v7, 0 }
  0x24   :  { %v175_v11 = vand.u32 2147483647, %v454_v8  ;;  %v178_v12 = vand.u32 2139095040, %v454_v8 }
  0x25   :  { %v60_v13 = vshrl.u32 %v59_v10, 23  ;;  %v63_v14 = vand.u32 8388607, %v56_v9  ;;  %vm515_vm15 = vcmp.le.f32.partialorder %v56_v9, 0.7853982 }
  0x26   :  { %v179_v15 = vshrl.u32 %v178_v12, 23  ;;  %v182_v16 = vand.u32 8388607, %v175_v11 }
  0x27   :  { %v306_v17 = vadd.s32 4294967169, %v60_v13  ;;  %v64_v20 = vor.u32 8388608, %v63_v14 }
  0x28   :  { %v313_v18 = vadd.s32 4294967169, %v179_v15  ;;  %v183_v21 = vor.u32 8388608, %v182_v16 }
  0x29   :  { %v66_v19 = vadd.s32 1, %v306_v17  ;;  %v464_v27 = vshll.u32 %v64_v20, 8 }
  0x2a   :  { %v185_v22 = vadd.s32 1, %v313_v18  ;;  %v466_v29 = vshll.u32 %v183_v21, 8 }
  0x2b   :  { %vm67_vm0 = vcmp.gt.s32.totalorder %v66_v19, 0 }
  0x2c   :  { %v68_v23 = vsel %vm67_vm0, %v66_v19, 0  ;;  %vm186_vm1 = vcmp.gt.s32.totalorder %v185_v22, 0  ;;  %vm177_vm0 = vcmp.lt.s32.totalorder %v454_v8, 0 }
  0x2d   :  { %v69_v24 = vshrl.u32 %v68_v23, 5  ;;  %v70_v25 = vand.u32 31, %v68_v23  ;;  %v187_v26 = vsel %vm186_vm1, %v185_v22, 0  ;;  %vm525_vm1 = vcmp.le.f32.partialorder %v175_v11, 0.7853982 }
  0x2e   :  { %v189_v28 = vand.u32 31, %v187_v26  ;;  %v468_v41 = vshrl.u32 %v187_v26, 5 }
  0x2f   :  { %v71_v30 = vsub.s32 32, %v70_v25  ;;  %v73_v32 = vshll.u32 %v417_v31, %v70_v25  ;;  %v76_v34 = vshll.u32 %v418_v33, %v70_v25  ;;  %v79_v36 = vshll.u32 %v419_v35, %v70_v25 }
  0x30   :  { %v82_v38 = vshll.u32 %v420_v37, %v70_v25  ;;  %v85_v40 = vshll.u32 %v421_v39, %v70_v25  ;;  %vm88_vm2 = vcmp.lt.s32.totalorder %v69_v24, 1  ;;  %vm89_vm3 = vcmp.lt.s32.totalorder %v69_v24, 2 }
  0x31   :  { %v72_v42 = vshrl.u32 %v417_v31, %v71_v30  ;;  %v74_v43 = vshrl.u32 %v418_v33, %v71_v30  ;;  %v77_v44 = vshrl.u32 %v419_v35, %v71_v30  ;;  %v80_v45 = vshrl.u32 %v420_v37, %v71_v30 }
  0x32   :  { %v83_v46 = vshrl.u32 %v421_v39, %v71_v30  ;;  %v86_v48 = vshrl.u32 %v422_v47, %v71_v30  ;;  %vm91_vm4 = vcmp.lt.s32.totalorder %v69_v24, 4  ;;  %v190_v52 = vsub.s32 32, %v189_v28 }
  0x33   :  { %v75_v49 = vor.u32 %v74_v43, %v73_v32  ;;  %v78_v50 = vor.u32 %v77_v44, %v76_v34  ;;  %v81_v51 = vor.u32 %v80_v45, %v79_v36  ;;  %vm90_vm5 = vcmp.lt.s32.totalorder %v69_v24, 3 }
  0x34   :  { %v84_v53 = vor.u32 %v83_v46, %v82_v38  ;;  %v87_v54 = vor.u32 %v86_v48, %v85_v40  ;;  %v192_v55 = vshll.u32 %v417_v31, %v189_v28  ;;  %v195_v63 = vshll.u32 %v418_v33, %v189_v28 }
  0x35   :  { %v92_v56 = vsel %vm88_vm2, %v72_v42, %v75_v49  ;;  %v93_v57 = vsel %vm91_vm4, %v81_v51, 2102212464  ;;  %v96_v58 = vsel %vm88_vm2, %v75_v49, %v78_v50  ;;  %v100_v59 = vsel %vm88_vm2, %v78_v50, %v81_v51 }
  0x36   :  { %v94_v60 = vsel %vm90_vm5, %v78_v50, %v93_v57  ;;  %v97_v61 = vsel %vm91_vm4, %v84_v53, 920167782  ;;  %v101_v62 = vsel %vm91_vm4, %v87_v54, 1326507024  ;;  %v191_v3 = vshrl.u32 %v417_v31, %v190_v52 }
  0x37   :  { %v98_v1 = vsel %vm90_vm5, %v81_v51, %v97_v61  ;;  %v102_v2 = vsel %vm90_vm5, %v84_v53, %v101_v62  ;;  %v193_v4 = vshrl.u32 %v418_v33, %v190_v52  ;;  %v95_v5 = vsel %vm89_vm3, %v92_v56, %v94_v60 }
  0x38   :  { %v99_v6 = vsel %vm89_vm3, %v96_v58, %v98_v1  ;;  %v103_v10 = vsel %vm89_vm3, %v100_v59, %v102_v2  ;;  %v196_v12 = vshrl.u32 %v419_v35, %v190_v52  ;;  %v198_v19 = vshll.u32 %v419_v35, %v189_v28 }
  0x39   :  { %v477_v13 = vmul.u32.u64.low %v464_v27, %v103_v10  ;;  %v478_v14 = vmul.u32.u64.high %v464_v27, %v103_v10, %v477_v13  ;;  %v481_v15 = vmul.u32.u64.low %v464_v27, %v99_v6  ;;  %v482_v16 = vmul.u32.u64.high %v464_v27, %v99_v6, %v481_v15 }
  0x3a   :  { %v194_v17 = vor.u32 %v193_v4, %v192_v55  ;;  %v197_v18 = vor.u32 %v196_v12, %v195_v63  ;;  %v199_v20 = vshrl.u32 %v420_v37, %v190_v52  ;;  %v201_v21 = vshll.u32 %v420_v37, %v189_v28 }
  0x3b   :  { %v202_v22 = vshrl.u32 %v421_v39, %v190_v52  ;;  %v204_v23 = vshll.u32 %v421_v39, %v189_v28  ;;  %v205_v25 = vshrl.u32 %v422_v47, %v190_v52  ;;  %v111_v24 = vmul.u32 %v464_v27, %v95_v5 }
  0x3c   :  { %v200_v26 = vor.u32 %v199_v20, %v198_v19  ;;  %vm207_vm6 = vcmp.lt.s32.totalorder %v468_v41, 1  ;;  %vm208_vm7 = vcmp.lt.s32.totalorder %v468_v41, 2  ;;  %vm113_vm8 = vc.u32 %v478_v14, %v481_v15 }
  0x3d   :  { %v114_v30 = vadd.s32 1, %v482_v16  ;;  %v203_v31 = vor.u32 %v202_v22, %v201_v21  ;;  %vm209_vm9 = vcmp.lt.s32.totalorder %v468_v41, 3  ;;  %v206_v32 = vor.u32 %v205_v25, %v204_v23 }
  0x3e   :  { %vm210_vm10 = vcmp.lt.s32.totalorder %v468_v41, 4  ;;  %v211_v33 = vsel %vm207_vm6, %v191_v3, %v194_v17  ;;  %v215_v28 = vsel %vm207_vm6, %v194_v17, %v197_v18  ;;  %v219_v36 = vsel %vm207_vm6, %v197_v18, %v200_v26 }
  0x3f   :  { %v115_v34 = vsel %vm113_vm8, %v114_v30, %v482_v16  ;;  %v212_v27 = vsel %vm210_vm10, %v200_v26, 2102212464  ;;  %v216_v35 = vsel %vm210_vm10, %v203_v31, 920167782  ;;  %v220_v40 = vsel %vm210_vm10, %v206_v32, 1326507024 }
  0x40   :  { %v116_v37 = vadd.s32 %v115_v34, %v111_v24  ;;  %v213_v38 = vsel %vm209_vm9, %v197_v18, %v212_v27  ;;  %v217_v39 = vsel %vm209_vm9, %v200_v26, %v216_v35  ;;  %v221_v44 = vsel %vm209_vm9, %v203_v31, %v220_v40 }
  0x41   :  { %v214_v42 = vsel %vm208_vm7, %v211_v33, %v213_v38  ;;  %v218_v43 = vsel %vm208_vm7, %v215_v28, %v217_v39  ;;  %v222_v46 = vsel %vm208_vm7, %v219_v36, %v221_v44  ;;  %v112_v2 = vadd.s32 %v481_v15, %v478_v14 }
  0x42   :  { %v117_v45 = vadd.s32 536870912, %v116_v37  ;;  %v499_v47 = vmul.u32.u64.low %v466_v29, %v218_v43  ;;  %v500_v48 = vmul.u32.u64.high %v466_v29, %v218_v43, %v499_v47  ;;  %v230_v52 = vmul.u32 %v466_v29, %v214_v42 }
  0x43   :  { %v503_v49 = vmul.u32.u64.low %v466_v29, %v222_v46  ;;  %v504_v50 = vmul.u32.u64.high %v466_v29, %v222_v46, %v503_v49  ;;  %vm148_vm5 = vweird.f32 %v452_v7  ;;  %vm267_vm9 = vweird.f32 %v454_v8 }
  0x44   :  { %v118_v51 = vshrl.u32 %v117_v45, 30  ;;  %v233_v54 = vadd.s32 1, %v500_v48 }
  0x45   :  { %vm232_vm11 = vc.u32 %v504_v50, %v499_v47  ;;  %v231_v22 = vadd.s32 %v499_v47, %v504_v50 }
  0x46   :  { %v119_v53 = vshll.u32 %v118_v51, 30  ;;  %v234_v41 = vsel %vm232_vm11, %v233_v54, %v500_v48  ;;  %v142_v35 = vsub.s32 4, %v118_v51 }
  0x47   :  { %v235_v56 = vadd.s32 %v234_v41, %v230_v52 }
  0x48   :  { %v120_v55 = vsub.s32 %v116_v37, %v119_v53  ;;  %v143_v40 = vsel %vm58_vm14, %v142_v35, %v118_v51 }
  0x49   :  { %v236_v58 = vadd.s32 536870912, %v235_v56  ;;  %v145_v45 = vsel %vm515_vm15, 0, %v143_v40 }
  0x4a   :  { %v122_v57 = vsub.s32 0, %v120_v55  ;;  %v149_v49 = vand.u32 3, %v145_v45 }
  0x4b   :  { %v237_v60 = vshrl.u32 %v236_v58, 30 }
  0x4c   :  { %v307_v59 = vmin.u32 %v122_v57, %v120_v55  ;;  %vm154_vm2 = vcmp.eq.s32.totalorder %v149_v49, 2  ;;  %vm151_vm3 = vcmp.eq.s32.totalorder %v149_v49, 0  ;;  %vm150_vm4 = vcmp.lt.s32.totalorder %v149_v49, 2 }
  0x4d   :  { %v238_v62 = vshll.u32 %v237_v60, 30  ;;  %v261_v9 = vsub.s32 4, %v237_v60 }
  0x4e   :  { %v124_v61 = vclz %v307_v59 }
  0x4f   :  { %v239_v1 = vsub.s32 %v235_v56, %v238_v62  ;;  %v262_v47 = vsel %vm177_vm0, %v261_v9, %v237_v60 }
  0x50   :  { %v308_v63 = vadd.s32 4294967294, %v124_v61  ;;  %v264_v11 = vsel %vm525_vm1, 0, %v262_v47 }
  0x51   :  { %v241_v3 = vsub.s32 0, %v239_v1  ;;  %v268_v52 = vadd.s32 3, %v264_v11 }
  0x52   :  { %vm309_vm12 = vcmp.lt.s32.totalorder %v308_v63, 0 }
  0x53   :  { %v127_v29 = vsel %vm309_vm12, 0, %v308_v63  ;;  %v314_v10 = vmin.u32 %v241_v3, %v239_v1  ;;  %v269_v57 = vand.u32 3, %v268_v52 }
  0x54   :  { %v128_v4 = vsub.s32 32, %v127_v29  ;;  %v129_v5 = vshll.u32 %v120_v55, %v127_v29  ;;  %v132_v6 = vsub.s32 4294967266, %v127_v29  ;;  %v310_v55 = vld [vmem:[#allocation5 + $0x4] ss:$0 sm:$0xff] }
  0x55   :  { %v243_v16 = vclz %v314_v10  ;;  %vm274_vm6 = vcmp.eq.s32.totalorder %v269_v57, 2  ;;  %vm271_vm7 = vcmp.eq.s32.totalorder %v269_v57, 0  ;;  %vm270_vm8 = vcmp.lt.s32.totalorder %v269_v57, 2 }
  0x56   :  { %v130_v12 = vshrl.u32 %v112_v2, %v128_v4  ;;  %v133_v13 = vadd.s32 127, %v132_v6 }
  0x57   :  { %v315_v19 = vadd.s32 4294967294, %v243_v16 }
  0x58   :  { %v131_v17 = vor.u32 %v130_v12, %v129_v5  ;;  %v134_v18 = vshll.u32 %v133_v13, 23 }
  0x59   :  { %vm316_vm13 = vcmp.lt.s32.totalorder %v315_v19, 0 }
  0x5a   :  { %v135_v20 = vor.u32 4788187, %v134_v18  ;;  %v138_v21 = vcvt.s32.f32 %v131_v17  ;;  %v246_v14 = vsel %vm316_vm13, 0, %v315_v19 }
  0x5b   :  { %v247_v15 = vsub.s32 32, %v246_v14  ;;  %v248_v25 = vshll.u32 %v239_v1, %v246_v14  ;;  %v251_v24 = vsub.s32 4294967266, %v246_v14 }
  0x5c   :  { %v136_v23 = vand.u32 2147483647, %v135_v20 }
  0x5d   :  { %v249_v30 = vshrl.u32 %v231_v22, %v247_v15  ;;  %v252_v31 = vadd.s32 127, %v251_v24 }
  0x5e   :  { %v139_v26 = vmul.f32 %v138_v21, %v136_v23 }
  0x5f   :  { %v250_v28 = vor.u32 %v249_v30, %v248_v25  ;;  %v253_v34 = vshll.u32 %v252_v31, 23 }
  0x60   :  { %v140_v33 = vxor.u32 2147483648, %v139_v26 }
  0x61   :  { %v254_v37 = vor.u32 4788187, %v253_v34  ;;  %v257_v38 = vcvt.s32.f32 %v250_v28 }
  0x62   :  { %v141_v27 = vsel %vm58_vm14, %v140_v33, %v139_v26 }
  0x63   :  { %v144_v36 = vsel %vm515_vm15, %v452_v7, %v141_v27  ;;  %v255_v39 = vand.u32 2147483647, %v254_v37  ;;  %v317_v7 = vld [vmem:[#allocation5 + $0x5] ss:$0 sm:$0xff] }
  0x64   :  { %337 = vcosq.f32 %v144_v36 }
  0x65   :  { %339 = vsinq.f32 %v144_v36  ;;  %v258_v42 = vmul.f32 %v257_v38, %v255_v39 }
  0x66   :  { %341 = vtanh.f32 %v448_v0 }
  0x67   :  { %v259_v44 = vxor.u32 2147483648, %v258_v42 }
  0x69   :  { %v260_v46 = vsel %vm177_vm0, %v259_v44, %v258_v42 }
  0x6a   :  { %v263_v48 = vsel %vm525_vm1, %v454_v8, %v260_v46 }
  0x6b   :  { %343 = vcosq.f32 %v263_v48 }
  0x6c   :  { %345 = vsinq.f32 %v263_v48 }
  0x71   :  { %v338_v50 = vpop.eup %337 }
  0x72   :  { %v340_v51 = vpop.eup %339  ;;  %v155_v0 = vxor.u32 2147483648, %v338_v50 }
  0x73   :  { %v152_v53 = vxor.u32 2147483648, %v340_v51  ;;  %v342_v58 = vpop.eup %341 }
  0x74   :  { %v156_v54 = vsel %vm154_vm2, %v155_v0, %v340_v51 }
  0x75   :  { %v153_v41 = vsel %vm151_vm3, %v338_v50, %v152_v53 }
  0x76   :  { %v157_v56 = vsel %vm150_vm4, %v153_v41, %v156_v54 }
  0x77   :  { %v158_v59 = vsel %vm148_vm5, nan, %v157_v56 }
  0x78   :  { %v163_v60 = vmul.f32 %v310_v55, %v158_v59  ;;  %v344_v61 = vpop.eup %343 }
  0x79   :  { %v346_v63 = vpop.eup %345  ;;  %v275_v1 = vxor.u32 2147483648, %v344_v61 }
  0x7a   :  { %v164_v62 = vadd.f32 %v342_v58, %v163_v60  ;;  %v272_v2 = vxor.u32 2147483648, %v346_v63 }
  0x7b   :  { %v276_v29 = vsel %vm274_vm6, %v275_v1, %v346_v63 }
  0x7c   :  { %v273_v3 = vsel %vm271_vm7, %v344_v61, %v272_v2 }
  0x7d   :  { %v277_v4 = vsel %vm270_vm8, %v273_v3, %v276_v29 }
  0x7e   :  { %v278_v5 = vsel %vm267_vm9, nan, %v277_v4 }
  0x7f   :  { %v283_v6 = vmul.f32 %v317_v7, %v278_v5 }
  0x81   :  { %v284_v10 = vadd.f32 %v283_v6, %v164_v62 }
  0x83   :  { %285 = vst [vmem:[#allocation7] sm:$0xff] %v284_v10 }
  0x84   :  { %290 = vsyncadd [#allocation4], 96  ;;  %s423_s0 = smov [#allocation7]  }
  0x85   :  { %s291_s1 = sshll.u32 %s423_s0, 4  ;;  %s292_s1 = int_to_ptr.vmem [resolvable:$true] %s291_s1 }
  0x86   :  { %s387_s22 = scalar_lea.vmem %s292_s1, 32  ;;  %s391_s23 = scalar_lea.vmem %s292_s1, 128 }
  0x87   :  { %p388_p10 = scmp.ne.s32.totalorder %s292_s1, %s387_s22  ;;  %p392_p11 = scmp.lt.s32.totalorder %s292_s1, %s292_s1 }
  0x88   :  { %p393_p12 = scmp.lt.s32.totalorder %s391_s23, %s387_s22 }
  0x8a   :  { %p394_p13 = por %p393_p12, %p392_p11 }
  0x8c   :  { %p395_p0 = pnand %p394_p13, %p388_p10 }
  0x8e   :  { %398 = shalt.err (!%p395_p0)
}
  0x8f   :  { %297 = dma.vmem_to_hbm [thread:$0]  %s292_s1, 32, %s547_s2, [#allocation4], %s414_s13, %s414_s13, %s415_s14  }
  0x90   :  { %411 = dma.done.wait [#allocation4], 128  }
  0x91   :  { %412 = vsyncadd [#allocation4], 4294967168 }
  0x92   :  { %301 = vsyncpa [#allocation3], 1 }
  0x93   :  { %302 = vsyncpa [#allocation6], 1 }
  0x94   :  { %303 = vsyncpa [#allocation4], 1 }

</bundles_post_ra>
